<compile_context>
chip_gen: v6e
topology: v6e:2x2x1
jax: 0.10.0
libtpu: 0.0.40
codegen_flags: <defaults>
</compile_context>

<pallas_src>
import jax
import jax.numpy as jnp
from jax.experimental import pallas as pl
from jax.experimental.pallas import tpu as pltpu


def _round_up(x, m):
    return (x + m - 1) // m * m


def _adjust_kernel(x_ref, w_ref, b_ref, o_ref):
    # x_ref: (Cin, tm)   -- batch+space merged on the lane axis (lane-dense)
    # w_ref: (Cout, Cin) -- 1x1 conv weight with BN scale folded in
    # b_ref: (Cout, 1)   -- folded BN bias, f32
    # o_ref: (Cout, tm)
    acc = jnp.dot(w_ref[...], x_ref[...], preferred_element_type=jnp.float32)
    o_ref[...] = (acc + b_ref[...]).astype(o_ref.dtype)


def adjust_layer_forward(x_nchw, weight, gamma, beta, running_mean, running_var,
                         eps=1e-5, mxu_dtype=jnp.bfloat16, out_dtype=None):
    """AdjustLayer forward (inference).

    x_nchw: (N, Cin, H, W)
    weight: (Cout, Cin) or (Cout, Cin, 1, 1)  -- 1x1 conv kernel, no bias
    gamma/beta/running_mean/running_var: (Cout,) BatchNorm2d params (inference)
    mxu_dtype: dtype of the matmul inputs (default bf16; accumulate/epilogue
               stay f32).  Pass None to keep the input dtype (tight precision).
    """
    if weight.ndim == 4:
        weight = weight[:, :, 0, 0]
    N, Cin, H, W = x_nchw.shape
    Cout = weight.shape[0]
    out_dtype = x_nchw.dtype if out_dtype is None else jnp.dtype(out_dtype)

    # --- Crop FIRST (pointwise conv/BN commute with the spatial crop).
    # Note: if H or W < 11 the slice clamps (same as PyTorch slicing).
    if W < 20:
        x_nchw = x_nchw[:, :, 4:11, 4:11]
    Hc, Wc = x_nchw.shape[2], x_nchw.shape[3]
    M = Hc * Wc
    total = N * M

    # --- Fold BN (inference) into per-output-channel scale / bias (f32), and
    # fold the scale into the 1x1 conv weight BEFORE any downcast.
    scale = gamma.astype(jnp.float32) / jnp.sqrt(running_var.astype(jnp.float32) + eps)
    bias = beta.astype(jnp.float32) - running_mean.astype(jnp.float32) * scale
    w_folded = weight.astype(jnp.float32) * scale[:, None]          # (Cout, Cin)

    mm_dtype = x_nchw.dtype if mxu_dtype is None else jnp.dtype(mxu_dtype)
    in_bytes = jnp.dtype(mm_dtype).itemsize
    out_bytes = jnp.dtype(out_dtype).itemsize

    # --- Lane-dense layout: merge (batch, space) onto the lane axis.
    # (N, Cin, M) -> (Cin, N*M); column index is n*M + m.
    x_merged = (x_nchw.reshape(N, Cin, M)
                .transpose(1, 0, 2)
                .reshape(Cin, total)
                .astype(mm_dtype))
    w_in = w_folded.astype(mm_dtype)                                # (Cout, Cin)
    bias2d = bias.reshape(Cout, 1)                                  # f32

    # --- Pick a lane tile (multiple of 128).  Budget keeps (up to 3x) input
    # and (2x) output pipeline buffers well inside every chip's scoped VMEM.
    budget = 16 * 1024 * 1024
    per_lane_bytes = 3 * Cin * in_bytes + 2 * Cout * out_bytes
    tm_cap = max(128, (budget // per_lane_bytes) // 128 * 128)
    tm = min(_round_up(total, 128), 2048, tm_cap)
    padded = _round_up(total, tm)
    num_tiles = padded // tm
    if padded != total:
        x_merged = jnp.pad(x_merged, ((0, 0), (0, padded - total)))

    x_spec = pl.BlockSpec((Cin, tm), lambda i: (0, i))
    if num_tiles > 2:
        # Deeper input pipelining only when there are enough tiles to hide the
        # DMA behind the (tiny) per-tile MXU work.
        x_spec = pl.BlockSpec((Cin, tm), lambda i: (0, i),
                              pipeline_mode=pl.Buffered(3))

    out_merged = pl.pallas_call(
        _adjust_kernel,
        out_shape=jax.ShapeDtypeStruct((Cout, padded), out_dtype),
        grid=(num_tiles,),
        in_specs=[
            x_spec,                                            # streamed
            pl.BlockSpec((Cout, Cin), lambda i: (0, 0)),       # resident weight
            pl.BlockSpec((Cout, 1), lambda i: (0, 0)),         # resident bias
        ],
        out_specs=pl.BlockSpec((Cout, tm), lambda i: (0, i)),
        # Lane tiles are independent -> "parallel" shards them across both
        # TensorCores on v7x (measured-neutral on v5e/v6e).
        compiler_params=pltpu.CompilerParams(
            dimension_semantics=("parallel",),
            vmem_limit_bytes=32 * 1024 * 1024),
    )(x_merged, w_in, bias2d)

    # --- Unmerge: (Cout, N*M) -> (N, Cout, Hc, Wc).
    out = out_merged[:, :total].reshape(Cout, N, M)
    out = out.transpose(1, 0, 2).reshape(N, Cout, Hc, Wc)
    return out


def _reference(x, weight, gamma, beta, running_mean, running_var, eps=1e-5):
    scale = gamma / jnp.sqrt(running_var + eps)
    bias = beta - running_mean * scale
    y = jnp.einsum("nchw,oc->nohw", x, weight)
    y = y * scale[None, :, None, None] + bias[None, :, None, None]
    if x.shape[3] < 20:
        y = y[:, :, 4:11, 4:11]
    return y


if __name__ == "__main__":
    # Small shapes consistent with the module's forward (spatial < 20 -> crop).
    N, Cin, Cout, H, Wsp = 2, 8, 16, 16, 16

    key = jax.random.PRNGKey(0)
    kx, kw, kg, kb, km, kv, kx2 = jax.random.split(key, 7)

    x = jax.random.normal(kx, (N, Cin, H, Wsp), dtype=jnp.float32)
    weight = jax.random.normal(kw, (Cout, Cin), dtype=jnp.float32) * 0.1
    gamma = 1.0 + 0.1 * jax.random.normal(kg, (Cout,), dtype=jnp.float32)
    beta = 0.1 * jax.random.normal(kb, (Cout,), dtype=jnp.float32)
    running_mean = 0.1 * jax.random.normal(km, (Cout,), dtype=jnp.float32)
    running_var = jnp.abs(jax.random.normal(kv, (Cout,), dtype=jnp.float32)) + 0.5

    ref = _reference(x, weight, gamma, beta, running_mean, running_var)

    # 1) Crop path (W < 20), default bf16 MXU inputs -> looser tolerance.
    out_bf16 = jax.block_until_ready(
        adjust_layer_forward(x, weight, gamma, beta, running_mean, running_var))
    assert out_bf16.shape == (N, Cout, 7, 7), out_bf16.shape
    assert jnp.allclose(out_bf16, ref, atol=5e-2, rtol=5e-2), \
        float(jnp.max(jnp.abs(out_bf16 - ref)))

    # 2) Same path with full-f32 MXU inputs -> tight tolerance.
    out_f32 = jax.block_until_ready(
        adjust_layer_forward(x, weight, gamma, beta, running_mean, running_var,
                             mxu_dtype=None))
    assert out_f32.shape == (N, Cout, 7, 7), out_f32.shape
    assert jnp.allclose(out_f32, ref, atol=1e-4, rtol=1e-4), \
        float(jnp.max(jnp.abs(out_f32 - ref)))

    # 3) No-crop path (W >= 20): merged lane dim 2*576 = 1152 (128-aligned).
    x_big = jax.random.normal(kx2, (N, Cin, 24, 24), dtype=jnp.float32)
    ref_big = _reference(x_big, weight, gamma, beta, running_mean, running_var)
    out_big = jax.block_until_ready(
        adjust_layer_forward(x_big, weight, gamma, beta, running_mean,
                             running_var, mxu_dtype=None))
    assert out_big.shape == (N, Cout, 24, 24), out_big.shape
    assert jnp.allclose(out_big, ref_big, atol=1e-4, rtol=1e-4)

    print("KERNEL_OK")
</pallas_src>

<mosaic_0001>
module attributes {stable_mosaic.version = 11 : i64} {
  func.func @_adjust_kernel(%arg0: i32, %arg1: memref<8x128xbf16, #tpu.memory_space<vmem>>, %arg2: memref<16x8xbf16, #tpu.memory_space<vmem>>, %arg3: memref<16x1xf32, #tpu.memory_space<vmem>>, %arg4: memref<16x128xf32, #tpu.memory_space<vmem>>) attributes {dimension_semantics = [#tpu.dimension_semantics<parallel>], iteration_bounds = array<i64: 1>, scalar_prefetch = 0 : i64, scratch_operands = 0 : i64, tpu.core_type = #tpu.core_type<tc>, window_params = [{transform_indices = @transform_0, window_bounds = array<i64: 8, 128>}, {pipeline_mode = #tpu.pipeline_mode<synchronous>, transform_indices = @transform_1, window_bounds = array<i64: 16, 8>}, {pipeline_mode = #tpu.pipeline_mode<synchronous>, transform_indices = @transform_2, window_bounds = array<i64: 16, 1>}, {transform_indices = @transform_3, window_bounds = array<i64: 16, 128>}]} {
    %c0 = arith.constant 0 : index
    %c0_0 = arith.constant 0 : index
    %0 = vector.load %arg2[%c0, %c0_0] : memref<16x8xbf16, #tpu.memory_space<vmem>>, vector<16x8xbf16>
    %c0_1 = arith.constant 0 : index
    %c0_2 = arith.constant 0 : index
    %1 = vector.load %arg1[%c0_1, %c0_2] : memref<8x128xbf16, #tpu.memory_space<vmem>>, vector<8x128xbf16>
    %cst = arith.constant dense<0.000000e+00> : vector<16x128xf32>
    %2 = tpu.matmul %0, %1, %cst {dimension_numbers = #tpu.dot_dimension_numbers<[1], [0], [0], [1], [0, 0, 1, 1], [], []>} : vector<16x8xbf16>, vector<8x128xbf16>, vector<16x128xf32> -> vector<16x128xf32>
    %c0_3 = arith.constant 0 : index
    %c0_4 = arith.constant 0 : index
    %3 = vector.load %arg3[%c0_3, %c0_4] : memref<16x1xf32, #tpu.memory_space<vmem>>, vector<16x1xf32>
    %4 = vector.broadcast %3 : vector<16x1xf32> to vector<16x128xf32>
    %5 = arith.addf %2, %4 : vector<16x128xf32>
    %c0_5 = arith.constant 0 : index
    %c0_6 = arith.constant 0 : index
    %6 = vector.load %arg4[%c0_5, %c0_6] : memref<16x128xf32, #tpu.memory_space<vmem>>, vector<16x128xf32>
    tpu.vector_store %arg4[%c0_5, %c0_6], %5 {strides = array<i32>} : memref<16x128xf32, #tpu.memory_space<vmem>>, vector<16x128xf32>,
    return
  }
  func.func @transform_0(%arg0: i32) -> (i32, i32) {
    %c0_i32 = arith.constant 0 : i32
    %c0_i32_0 = arith.constant 0 : i32
    return %c0_i32, %arg0 : i32, i32
  }
  func.func @transform_1(%arg0: i32) -> (i32, i32) {
    %c0_i32 = arith.constant 0 : i32
    %c0_i32_0 = arith.constant 0 : i32
    %c0_i32_1 = arith.constant 0 : i32
    return %c0_i32, %c0_i32_0 : i32, i32
  }
  func.func @transform_2(%arg0: i32) -> (i32, i32) {
    %c0_i32 = arith.constant 0 : i32
    %c0_i32_0 = arith.constant 0 : i32
    %c0_i32_1 = arith.constant 0 : i32
    return %c0_i32, %c0_i32_0 : i32, i32
  }
  func.func @transform_3(%arg0: i32) -> (i32, i32) {
    %c0_i32 = arith.constant 0 : i32
    %c0_i32_0 = arith.constant 0 : i32
    return %c0_i32, %arg0 : i32, i32
  }
}

</mosaic_0001>

<bundles_post_ra>
// kernel: tpu_custom_call.1
= control target key start
LH: loop header
LB: loop body
LE: loop exit
PB: predicated region body
PF: predicated region fallthrough
CT: control target
= control target key end

     0   :  { %vm40_vm0 = vcmask 1043456   ;;  %v143_v1 = vmov 0.0   ;;  %vm144_vm1 = vmmov 0   ;;  %vm36_vm2 = vcmask 64512   ;;  %s184_s0 = inlined_call_operand.vmem [shape: bf16[8,128], index: 0, kind: input, shape index: {}]   ;;  %s185_s1 = inlined_call_operand.vmem [shape: bf16[16,8], index: 1, kind: input, shape index: {}]   ;;  %s186_s2 = inlined_call_operand.vmem [shape: f32[16,1], index: 2, kind: input, shape index: {}]   ;;  %s187_s3 = inlined_call_operand.hbm [shape: f32[16,128], index: 3, kind: output, shape index: {}]  }
   0x1   :  { %v18_v0 = vld [vmem:[%s184_s0] sm:$0xf]  ;;  %107 = vmatprep.subr.bf16.mxu0 %v143_v1  ;;  %109 = vmatprep.mubr.msk.bf16.mxu0 %vm144_vm1, %v143_v1 }
   0x2   :  { %v42_v2 = vsel %vm40_vm0, %v18_v0, 0  ;;  %v120_v3 = vld [vmem:[%s185_s1] sm:$0xff]  }
   0x3   :  { %108 = vmatpush3.bf16.msra.mxu0 %v42_v2  ;;  %v19_v4 = vld [vmem:[%s186_s2] sm:$0xff] }
   0x4   :  { %8 = vsyncpa [#allocation3], 0  ;;  %v145_v5 = vmov 0   ;;  %v20_v6 = vld [vmem:[%s186_s2 + $0x8] sm:$0xff]  ;;  %s146_s1 = smov [#allocation2]  }
   0x5   :  { %119 = vset.pattern.permute.xlu0 %v145_v5  ;;  %s92_s19 = sshll.u32 %s146_s1, 4  ;;  %s93_s19 = int_to_ptr.vmem [resolvable:$true] %s92_s19 }
   0x6   :  { %23 = vperm.xlu0 %119, %v19_v4   ;;  %110 = vmatmul.mubr.msk.bf16.vlgmr.msra.gmra.mxu0 %vm36_vm2, %v120_v3  ;;  %s121_s20 = scalar_lea.vmem %s93_s19, 256  ;;  %p126_p1 = scmp.lt.s32.totalorder %s93_s19, %s93_s19 }
   0x7   :  { %p122_p0 = scmp.ne.s32.totalorder %s93_s19, %s121_s20  ;;  %p127_p2 = scmp.lt.s32.totalorder %s121_s20, %s121_s20 }
   0x9   :  { %p128_p3 = por %p127_p2, %p126_p1 }
   0xa   :  { %28 = vperm.xlu0 %119, %v20_v6  }
   0xb   :  { %p129_p4 = pnand %p128_p3, %p122_p0 }
  0x81   :  { %v24_v7 = vpop.permute.xlu0 %23 }
  0x85   :  { %v29_v11 = vpop.permute.xlu0 %28 }
  0xc6   :  { %v78_v8 = vpop.f32.mrf.mxu0 }
  0xc7   :  { %v79_v9 = vadd.f32 %v78_v8, %v24_v7 }
  0xc8   :  { %v111_v10 = vpop.f32.mrf.mxu0 }
  0xc9   :  { %85 = vst [vmem:[#allocation2] sm:$0xff] %v79_v9 }
  0xca   :  { %v81_v12 = vpop.f32.mrf.mxu0 }
  0xcb   :  { %v82_v13 = vadd.f32 %v81_v12, %v29_v11 }
  0xcc   :  { %v112_v14 = vpop.f32.mrf.mxu0 }
  0xcd   :  { %86 = vst [vmem:[#allocation2 + $0x8] sm:$0xff] %v82_v13 }
  0xce   :  { %132 = shalt.err (!%p129_p4)
}
  0xcf   :  { %s147_s2 = smov 128   ;;  %s148_s21 = smov 8  }
  0xd0   :  { %98 = dma.vmem_to_hbm [thread:$0]  %s93_s19, 256, %s187_s3, [#allocation3], %s147_s2, %s147_s2, %s148_s21  }
  0xd1   :  { %141 = dma.done.wait [#allocation3], 256  }
  0xd2   :  { %142 = vsyncadd [#allocation3], 4294967040 }
  0xd3   :  { %102 = vsyncpa [#allocation3], 1 }

</bundles_post_ra>
